<compile_context>
chip_gen: v5e
topology: v5e:2x2
jax: 0.10.0
libtpu: 0.0.40
codegen_flags: <defaults>
</compile_context>

<pallas_src>
import jax
import jax.numpy as jnp
from jax.experimental import pallas as pl
from jax.experimental.pallas import tpu as pltpu


def _mlp_kernel(x_ref, w1_ref, b1_ref, w2_ref, b2_ref, ot_ref):
    # x_ref:  [tb, D]  (f32 or bf16 as supplied by caller)
    # w1_ref: [H, D]   bf16   (PyTorch nn.Linear layout [out, in], resident)
    # b1_ref: [H, 1]   f32
    # w2_ref: [H, 1]   f32    (output-layer weights as a column)
    # b2_ref: (1,)     f32    (scalar in SMEM)
    # ot_ref: [1, tb]  f32    (lane-dense transposed output)

    # Cast the activation tile in VMEM (free VPU filler under the DMA); the
    # wrapper never touches x in HBM.
    x_bf = x_ref[...].astype(jnp.bfloat16)

    # Hidden layer on the MXU: contract D of both operands -> h^T = W1 @ x^T,
    # shape [H, tb] with the batch on the lane axis. f32 accumulation.
    h = jax.lax.dot_general(
        w1_ref[...], x_bf,
        dimension_numbers=(((1,), (1,)), ((), ())),
        preferred_element_type=jnp.float32,
    )
    h = jax.nn.sigmoid(h + b1_ref[...])                   # f32, broadcast [H, 1]

    # Output layer (N=1): VPU multiply + cross-sublane reduction instead of an
    # MXU matmul that would only use a single output lane.
    o = jnp.sum(h * w2_ref[...], axis=0, keepdims=True)   # [1, tb]
    o = o + b2_ref[0]                                      # SMEM scalar
    ot_ref[...] = jax.nn.sigmoid(o).astype(ot_ref.dtype)


def _round_up(x, m):
    return -(-x // m) * m


def _vmem_capacity_bytes():
    """Physical VMEM of the current chip; conservative fallback = v7x (64 MiB)."""
    try:
        info = pltpu.get_tpu_info()
        cap = getattr(info, "vmem_capacity_bytes", None)
        if cap:
            return int(cap)
    except Exception:
        pass
    return 64 << 20


def _auto_tile(B, D, H, x_bytes, budget_bytes):
    """Pick (tile_b, steps) from a VMEM byte budget.

    Per batch element per step we need:
      2 * D * x_bytes   x tile, double-buffered
      D * 2             in-kernel bf16 copy of the x tile
      2 * H * 4         h + activation intermediates (f32)
      2 * 4             output tile, double-buffered
    plus resident (double-buffered) weights: W1 bf16 + b1 + w2.
    """
    per_elem = 2 * D * x_bytes + D * 2 + 2 * H * 4 + 2 * 4
    resident = 2 * (H * D * 2 + 2 * H * 4)
    avail = max(budget_bytes - resident, per_elem * 128)
    cap = max(128, (avail // per_elem) // 128 * 128)   # largest 128-multiple tile

    if B <= cap:
        return B, 1                                    # single whole-batch tile

    steps = -(-B // cap)
    if steps % 2 == 1:                                 # even step count (2-TC balance)
        steps += 1
    tb = _round_up(-(-B // steps), 128)
    return tb, steps


def classification_forward(x, w1, b1, w2, b2, *, tile_b=None):
    """Forward pass.

    Shapes follow the PyTorch module exactly:
      x:  [B, D]       w1: [H, D] (H = 2*D)    b1: [H]
      w2: [1, H]       b2: [1]
    Returns y: [B, 1] float32.
    """
    B, D = x.shape
    H, D2 = w1.shape
    assert D == D2, (D, D2)

    x_bytes = jnp.dtype(x.dtype).itemsize
    cap_bytes = _vmem_capacity_bytes()
    # ~1/3 of physical VMEM for this kernel, capped at 40 MiB (=> ~21 MiB on v7x).
    budget = min(cap_bytes // 3, 40 << 20)

    if tile_b is None:
        tile_b, steps = _auto_tile(B, D, H, x_bytes, budget)
    else:
        steps = -(-B // tile_b)
    # Lane-dense output tiles require a 128-multiple tile whenever we actually tile.
    assert steps == 1 or tile_b % 128 == 0, (tile_b, steps)
    B_pad = steps * tile_b

    # Pad ragged batches with zero rows; sliced off below.
    x_in = x if B_pad == B else jnp.pad(x, ((0, B_pad - B), (0, 0)))

    # Small resident operands: pre-cast in the wrapper (one tiny pass each).
    w1_bf = w1.astype(jnp.bfloat16)
    b1_c = b1.reshape(H, 1).astype(jnp.float32)
    w2_c = w2.reshape(H, 1).astype(jnp.float32)
    b2_c = b2.reshape(1).astype(jnp.float32)

    # Explicit scoped-VMEM limit: estimated usage + headroom, well below physical.
    est = (2 * (H * D * 2 + 2 * H * 4)          # resident weights, double-buffered
           + 2 * tile_b * D * x_bytes            # x tile, double-buffered
           + tile_b * D * 2                      # in-kernel bf16 copy of x tile
           + 2 * H * tile_b * 4                  # h + activation (f32)
           + 2 * tile_b * 4)                     # output tile, double-buffered
    vmem_limit = int(min(cap_bytes * 3 // 4, max(32 << 20, est + (8 << 20))))

    out_t = pl.pallas_call(
        _mlp_kernel,
        out_shape=jax.ShapeDtypeStruct((1, B_pad), jnp.float32),  # pinned f32
        grid_spec=pltpu.PrefetchScalarGridSpec(
            num_scalar_prefetch=0,
            grid=(steps,),
            in_specs=[
                pl.BlockSpec((tile_b, D), lambda i: (i, 0)),        # x tile (orig dtype)
                pl.BlockSpec((H, D),      lambda i: (0, 0)),        # W1 resident (bf16)
                pl.BlockSpec((H, 1),      lambda i: (0, 0)),        # b1 (f32)
                pl.BlockSpec((H, 1),      lambda i: (0, 0)),        # W2 column (f32)
                pl.BlockSpec(memory_space=pltpu.MemorySpace.SMEM),  # b2 scalar
            ],
            out_specs=pl.BlockSpec((1, tile_b), lambda i: (0, i)),
        ),
        compiler_params=pltpu.CompilerParams(
            dimension_semantics=("parallel",),
            vmem_limit_bytes=vmem_limit,
        ),
    )(x_in, w1_bf, b1_c, w2_c, b2_c)

    # [1, B_pad] lane-dense -> [B, 1] matching the PyTorch module's output layout.
    return out_t[:, :B].reshape(B, 1)


def reference_forward(x, w1, b1, w2, b2):
    """Pure-JAX f32 reference with PyTorch nn.Linear semantics."""
    h = jax.nn.sigmoid(x @ w1.T + b1)
    return jax.nn.sigmoid(h @ w2.T + b2)


if __name__ == "__main__":
    key = jax.random.PRNGKey(0)

    # --- tiny shape matching the module's intent (input_dim=16, hidden=32) ---
    B, D = 8, 16
    H = 2 * D
    kx, kw1, kb1, kw2, kb2 = jax.random.split(key, 5)
    x = jax.random.normal(kx, (B, D), dtype=jnp.float32)
    w1 = jax.random.normal(kw1, (H, D), dtype=jnp.float32) * 0.1   # [out, in]
    b1 = jax.random.normal(kb1, (H,), dtype=jnp.float32) * 0.1
    w2 = jax.random.normal(kw2, (1, H), dtype=jnp.float32) * 0.1
    b2 = jax.random.normal(kb2, (1,), dtype=jnp.float32) * 0.1

    out = jax.block_until_ready(classification_forward(x, w1, b1, w2, b2))
    ref = reference_forward(x, w1, b1, w2, b2)
    assert out.shape == (B, 1)
    assert out.dtype == jnp.float32
    assert jnp.allclose(out, ref, atol=2e-2, rtol=2e-2), (out, ref)

    # --- larger shape: auto tile selection (single whole-batch tile here) ---
    B2, D2 = 512, 128
    H2 = 2 * D2
    k2 = jax.random.split(key, 6)
    x2 = jax.random.normal(k2[1], (B2, D2), dtype=jnp.float32)
    w1_2 = jax.random.normal(k2[2], (H2, D2), dtype=jnp.float32) * 0.05
    b1_2 = jax.random.normal(k2[3], (H2,), dtype=jnp.float32) * 0.05
    w2_2 = jax.random.normal(k2[4], (1, H2), dtype=jnp.float32) * 0.05
    b2_2 = jax.random.normal(k2[5], (1,), dtype=jnp.float32) * 0.05

    out2 = jax.block_until_ready(
        classification_forward(x2, w1_2, b1_2, w2_2, b2_2))
    ref2 = reference_forward(x2, w1_2, b1_2, w2_2, b2_2)
    assert out2.shape == (B2, 1)
    assert jnp.allclose(out2, ref2, atol=2e-2, rtol=2e-2)

    # --- ragged batch + forced small tile: exercises pad-and-tile multi-step path ---
    B3 = 300
    x3 = jax.random.normal(k2[0], (B3, D2), dtype=jnp.float32)
    out3 = jax.block_until_ready(
        classification_forward(x3, w1_2, b1_2, w2_2, b2_2, tile_b=128))
    ref3 = reference_forward(x3, w1_2, b1_2, w2_2, b2_2)
    assert out3.shape == (B3, 1)
    assert jnp.allclose(out3, ref3, atol=2e-2, rtol=2e-2)

    print("KERNEL_OK")
</pallas_src>

<mosaic_0001>
module attributes {stable_mosaic.version = 11 : i64} {
  func.func @_mlp_kernel(%arg0: i32, %arg1: memref<8x16xf32, #tpu.memory_space<vmem>>, %arg2: memref<32x16xbf16, #tpu.memory_space<vmem>>, %arg3: memref<32x1xf32, #tpu.memory_space<vmem>>, %arg4: memref<32x1xf32, #tpu.memory_space<vmem>>, %arg5: memref<1xf32, #tpu.memory_space<smem>>, %arg6: memref<1x8xf32, #tpu.memory_space<vmem>>) attributes {dimension_semantics = [#tpu.dimension_semantics<parallel>], iteration_bounds = array<i64: 1>, scalar_prefetch = 0 : i64, scratch_operands = 0 : i64, tpu.core_type = #tpu.core_type<tc>, window_params = [{transform_indices = @transform_0, window_bounds = array<i64: 8, 16>}, {pipeline_mode = #tpu.pipeline_mode<synchronous>, transform_indices = @transform_1, window_bounds = array<i64: 32, 16>}, {pipeline_mode = #tpu.pipeline_mode<synchronous>, transform_indices = @transform_2, window_bounds = array<i64: 32, 1>}, {pipeline_mode = #tpu.pipeline_mode<synchronous>, transform_indices = @transform_3, window_bounds = array<i64: 32, 1>}, {transform_indices = @transform_4, window_bounds = array<i64: 1>}, {transform_indices = @transform_5, window_bounds = array<i64: 1, 8>}]} {
    %c0 = arith.constant 0 : index
    %c0_0 = arith.constant 0 : index
    %0 = vector.load %arg1[%c0, %c0_0] : memref<8x16xf32, #tpu.memory_space<vmem>>, vector<8x16xf32>
    %1 = arith.truncf %0 : vector<8x16xf32> to vector<8x16xbf16>
    %c0_1 = arith.constant 0 : index
    %c0_2 = arith.constant 0 : index
    %2 = vector.load %arg2[%c0_1, %c0_2] : memref<32x16xbf16, #tpu.memory_space<vmem>>, vector<32x16xbf16>
    %cst = arith.constant dense<0.000000e+00> : vector<32x8xf32>
    %3 = tpu.matmul %2, %1, %cst {dimension_numbers = #tpu.dot_dimension_numbers<[1], [1], [0], [0], [0, 0, 1, 0], [], []>} : vector<32x16xbf16>, vector<8x16xbf16>, vector<32x8xf32> -> vector<32x8xf32>
    %c0_3 = arith.constant 0 : index
    %c0_4 = arith.constant 0 : index
    %4 = vector.load %arg3[%c0_3, %c0_4] : memref<32x1xf32, #tpu.memory_space<vmem>>, vector<32x1xf32>
    %5 = vector.broadcast %4 : vector<32x1xf32> to vector<32x8xf32>
    %6 = arith.addf %3, %5 : vector<32x8xf32>
    %7 = arith.negf %6 : vector<32x8xf32>
    %8 = math.exp %7 : vector<32x8xf32>
    %cst_5 = arith.constant 1.000000e+00 : f32
    %9 = vector.broadcast %cst_5 : f32 to vector<32x8xf32>
    %10 = arith.addf %9, %8 : vector<32x8xf32>
    %11 = arith.divf %9, %10 : vector<32x8xf32>
    %c0_6 = arith.constant 0 : index
    %c0_7 = arith.constant 0 : index
    %12 = vector.load %arg4[%c0_6, %c0_7] : memref<32x1xf32, #tpu.memory_space<vmem>>, vector<32x1xf32>
    %13 = vector.broadcast %12 : vector<32x1xf32> to vector<32x8xf32>
    %14 = arith.mulf %11, %13 : vector<32x8xf32>
    %cst_8 = arith.constant dense<0.000000e+00> : vector<8xf32>
    %15 = vector.multi_reduction <add>, %14, %cst_8 [0] : vector<32x8xf32> to vector<8xf32>
    %16 = vector.shape_cast %15 : vector<8xf32> to vector<1x8xf32>
    %c0_9 = arith.constant 0 : index
    %17 = memref.load %arg5[%c0_9] : memref<1xf32, #tpu.memory_space<smem>>
    %18 = vector.broadcast %17 : f32 to vector<1x8xf32>
    %19 = arith.addf %16, %18 : vector<1x8xf32>
    %20 = arith.negf %19 : vector<1x8xf32>
    %21 = math.exp %20 : vector<1x8xf32>
    %cst_10 = arith.constant 1.000000e+00 : f32
    %22 = vector.broadcast %cst_10 : f32 to vector<1x8xf32>
    %23 = arith.addf %22, %21 : vector<1x8xf32>
    %24 = arith.divf %22, %23 : vector<1x8xf32>
    %c0_11 = arith.constant 0 : index
    %c0_12 = arith.constant 0 : index
    %25 = vector.load %arg6[%c0_11, %c0_12] : memref<1x8xf32, #tpu.memory_space<vmem>>, vector<1x8xf32>
    tpu.vector_store %arg6[%c0_11, %c0_12], %24 {strides = array<i32>} : memref<1x8xf32, #tpu.memory_space<vmem>>, vector<1x8xf32>,
    return
  }
  func.func @transform_0(%arg0: i32) -> (i32, i32) {
    %c0_i32 = arith.constant 0 : i32
    %c0_i32_0 = arith.constant 0 : i32
    return %arg0, %c0_i32 : i32, i32
  }
  func.func @transform_1(%arg0: i32) -> (i32, i32) {
    %c0_i32 = arith.constant 0 : i32
    %c0_i32_0 = arith.constant 0 : i32
    %c0_i32_1 = arith.constant 0 : i32
    return %c0_i32, %c0_i32_0 : i32, i32
  }
  func.func @transform_2(%arg0: i32) -> (i32, i32) {
    %c0_i32 = arith.constant 0 : i32
    %c0_i32_0 = arith.constant 0 : i32
    %c0_i32_1 = arith.constant 0 : i32
    return %c0_i32, %c0_i32_0 : i32, i32
  }
  func.func @transform_3(%arg0: i32) -> (i32, i32) {
    %c0_i32 = arith.constant 0 : i32
    %c0_i32_0 = arith.constant 0 : i32
    %c0_i32_1 = arith.constant 0 : i32
    return %c0_i32, %c0_i32_0 : i32, i32
  }
  func.func @transform_4(%arg0: i32) -> i32 {
    %c0_i32 = arith.constant 0 : i32
    %c0_i32_0 = arith.constant 0 : i32
    return %c0_i32 : i32
  }
  func.func @transform_5(%arg0: i32) -> (i32, i32) {
    %c0_i32 = arith.constant 0 : i32
    %c0_i32_0 = arith.constant 0 : i32
    return %c0_i32, %arg0 : i32, i32
  }
}

</mosaic_0001>

<bundles_post_ra>
// kernel: tpu_custom_call.1
= control target key start
LH: loop header
LB: loop body
LE: loop exit
PB: predicated region body
PF: predicated region fallthrough
CT: control target
= control target key end

     0   :  { %vm63_vm0 = vcmask 130048   ;;  %v319_v4 = vmov 0   ;;  %s409_s0 = inlined_call_operand.vmem [shape: f32[8,16], index: 0, kind: input, shape index: {}]   ;;  %s410_s1 = inlined_call_operand.vmem [shape: bf16[32,16], index: 1, kind: input, shape index: {}]   ;;  %s411_s2 = inlined_call_operand.vmem [shape: f32[32,1], index: 2, kind: input, shape index: {}]   ;;  %s412_s3 = inlined_call_operand.vmem [shape: f32[32,1], index: 3, kind: input, shape index: {}]   ;;  %s413_s4 = inlined_call_operand.<no memory space> [shape: f32[1], index: 4, kind: input, shape index: {}]   ;;  %s414_s5 = inlined_call_operand.hbm [shape: f32[1,8], index: 5, kind: output, shape index: {}]  }
   0x1   :  { %v23_v0 = vld [vmem:[%s409_s0] sm:$0xff]  ;;  %v31_v2 = vld [vmem:[%s411_s2 + $0x10] sm:$0xff]  ;;  %270 = vset.pattern.permute.xlu0 %v319_v4  ;;  %271 = vset.pattern.permute.xlu1 %v319_v4 }
   0x2   :  { %v29_v1 = vld [vmem:[%s411_s2] sm:$0xff]  ;;  %v24_v3 = vpack.c.bf16 %v23_v0, %v23_v0  ;;  %45 = vperm.xlu1 %271, %v31_v2   ;;  %272 = vset.pattern.permute.xlu2 %v319_v4 }
   0x3   :  { %35 = vperm.xlu0 %270, %v29_v1   ;;  %v168_v6 = vld [vmem:[%s412_s3] sm:$0xff] }
   0x4   :  { %v71_v5 = vsel %vm63_vm0, %v24_v3, 0 }
   0x5   :  { %11 = vsyncpa [#allocation4], 0  ;;  %80 = vmatpush.bf16.xpose.msra.mxu0 %v71_v5  ;;  %267 = vmatpush.bf16.xpose.msra.mxu1 %v71_v5  ;;  %v265_v7 = vld [vmem:[%s410_s1] sm:$0xff]  ;;  %v266_v8 = vld [vmem:[%s410_s1 + $0x8] sm:$0xff]  ;;  %vm196_vm15 = vcmask 64512   ;;  %s320_s13 = smov [#allocation3]  }
   0x6   :  { %174 = vperm.xlu2 %272, %v168_v6   ;;  %v30_v9 = vld [vmem:[%s411_s2 + $0x8] sm:$0xff]  ;;  %v32_v10 = vld [vmem:[%s411_s2 + $0x18] sm:$0xff]  ;;  %v170_v12 = vld [vmem:[%s412_s3 + $0x10] sm:$0xff]  ;;  %s239_s14 = sshll.u32 %s320_s13, 4  ;;  %s240_s14 = int_to_ptr.vmem [resolvable:$true] %s239_s14 }
   0x7   :  { %v169_v11 = vld [vmem:[%s412_s3 + $0x8] sm:$0xff]  ;;  %v171_v13 = vld [vmem:[%s412_s3 + $0x18] sm:$0xff] }
   0xa   :  { %50 = vperm.xlu1 %271, %v32_v10  }
   0xb   :  { %40 = vperm.xlu0 %270, %v30_v9  }
   0xc   :  { %258 = vmatmul.msk.bf16.vlgmr.msra.gmra.mxu0 %vm63_vm0, %v265_v7  ;;  %259 = vmatmul.msk.bf16.vlgmr.msra.gmra.mxu1 %vm63_vm0, %v266_v8 }
   0xe   :  { %179 = vperm.xlu2 %272, %v169_v11  }
  0x12   :  { %189 = vperm.xlu1 %271, %v171_v13  }
  0x13   :  { %184 = vperm.xlu0 %270, %v170_v12  }
  0x60   :  { %v175_v48 = vpop.permute.xlu2 %174 }
  0x74   :  { %v46_v15 = vpop.permute.xlu1 %45 }
  0x75   :  { %v36_v14 = vpop.permute.xlu0 %35 }
  0x7c   :  { %v51_v23 = vpop.permute.xlu1 %50 }
  0x7d   :  { %v41_v22 = vpop.permute.xlu0 %40 }
  0x85   :  { %v185_v13 = vpop.permute.xlu0 %184 }
  0x89   :  { %v82_v16 = vpop.f32.mrf.mxu0  ;;  %v87_v17 = vpop.f32.mrf.mxu1 }
  0x8a   :  { %v83_v18 = vadd.f32 %v82_v16, %v36_v14  ;;  %v88_v19 = vadd.f32 %v87_v17, %v46_v15  ;;  %v180_v14 = vpop.permute.xlu2 %179 }
  0x8c   :  { %v260_v20 = vmul.f32 -1.442695, %v83_v18  ;;  %v262_v21 = vmul.f32 -1.442695, %v88_v19 }
  0x8e   :  { %273 = vpow2.f32 %v260_v20 }
  0x8f   :  { %275 = vpow2.f32 %v262_v21  ;;  %v190_v21 = vpop.permute.xlu1 %189 }
  0x91   :  { %v84_v24 = vpop.f32.mrf.mxu0  ;;  %v89_v25 = vpop.f32.mrf.mxu1 }
  0x92   :  { %v85_v26 = vadd.f32 %v84_v24, %v41_v22  ;;  %v90_v27 = vadd.f32 %v89_v25, %v51_v23 }
  0x94   :  { %v274_v28 = vpop.eup %273  ;;  %v261_v29 = vmul.f32 -1.442695, %v85_v26  ;;  %v263_v32 = vmul.f32 -1.442695, %v90_v27 }
  0x95   :  { %v276_v30 = vpop.eup %275  ;;  %v104_v31 = vadd.f32 1.0, %v274_v28 }
  0x96   :  { %v106_v33 = vadd.f32 1.0, %v276_v30  ;;  %277 = vpow2.f32 %v261_v29 }
  0x97   :  { %279 = vrcp.f32 %v104_v31  ;;  %v117_v49 = vand.u32 2147483647, %v104_v31  ;;  %v119_v50 = vand.u32 2147483648, %v104_v31  ;;  %vm113_vm2 = vweird.f32 %v104_v31 }
  0x98   :  { %281 = vrcp.f32 %v106_v33  ;;  %v147_v54 = vand.u32 2147483647, %v106_v33  ;;  %v149_v55 = vand.u32 2147483648, %v106_v33  ;;  %vm143_vm5 = vweird.f32 %v106_v33 }
  0x99   :  { %283 = vpow2.f32 %v263_v32  ;;  %vm118_vm6 = vcmp.eq.f32.partialorder %v117_v49, 8.507059e+37  ;;  %v120_v61 = vor.u32 1.1754944e-38, %v119_v50 }
  0x9a   :  { %vm148_vm9 = vcmp.eq.f32.partialorder %v147_v54, 8.507059e+37  ;;  %v150_v4 = vor.u32 1.1754944e-38, %v149_v55 }
  0x9c   :  { %v278_v34 = vpop.eup %277 }
  0x9d   :  { %v280_v35 = vpop.eup %279  ;;  %v105_v36 = vadd.f32 1.0, %v278_v34 }
  0x9e   :  { %v282_v37 = vpop.eup %281  ;;  %v109_v38 = vmul.f32 %v280_v35, %v104_v31  ;;  %vm114_vm1 = vweird.f32 %v280_v35 }
  0x9f   :  { %v284_v39 = vpop.eup %283  ;;  %v139_v40 = vmul.f32 %v282_v37, %v106_v33  ;;  %285 = vrcp.f32 %v105_v36  ;;  %vm144_vm3 = vweird.f32 %v282_v37  ;;  %vm387_vm4 = vmor %vm113_vm2, %vm114_vm1  ;;  %v134_v59 = vand.u32 2147483648, %v105_v36 }
  0xa0   :  { %v107_v41 = vadd.f32 1.0, %v284_v39  ;;  %v110_v42 = vsub.f32 1.0, %v109_v38  ;;  %vm393_vm7 = vmor %vm143_vm5, %vm144_vm3  ;;  %v132_v0 = vand.u32 2147483647, %v105_v36  ;;  %vm128_vm10 = vweird.f32 %v105_v36 }
  0xa1   :  { %v140_v43 = vsub.f32 1.0, %v139_v40  ;;  %v135_v7 = vor.u32 1.1754944e-38, %v134_v59  ;;  %vm232_vm5 = vcmask 57344  }
  0xa2   :  { %287 = vrcp.f32 %v107_v41  ;;  %v111_v44 = vmul.f32 %v280_v35, %v110_v42  ;;  %v164_v5 = vand.u32 2147483648, %v107_v41  ;;  %v162_v10 = vand.u32 2147483647, %v107_v41 }
  0xa3   :  { %v141_v45 = vmul.f32 %v282_v37, %v140_v43  ;;  %vm133_vm13 = vcmp.eq.f32.partialorder %v132_v0, 8.507059e+37  ;;  %vm158_vm14 = vweird.f32 %v107_v41 }
  0xa4   :  { %v112_v46 = vadd.f32 %v280_v35, %v111_v44  ;;  %v165_v17 = vor.u32 1.1754944e-38, %v164_v5  ;;  %vm163_vm1 = vcmp.eq.f32.partialorder %v162_v10, 8.507059e+37 }
  0xa5   :  { %v286_v47 = vpop.eup %285  ;;  %v142_v52 = vadd.f32 %v282_v37, %v141_v45 }
  0xa6   :  { %v124_v51 = vmul.f32 %v286_v47, %v105_v36  ;;  %v116_v57 = vsel %vm387_vm4, %v280_v35, %v112_v46  ;;  %vm129_vm8 = vweird.f32 %v286_v47  ;;  %v211_v36 = vstv %s413_s4  ;;  %s241_s4 = sshll.u32 %s414_s5, 4  ;;  %s242_s4 = int_to_ptr.hbm [resolvable:$true] %s241_s4 }
  0xa7   :  { %v146_v1 = vsel %vm393_vm7, %v282_v37, %v142_v52  ;;  %v121_v3 = vsel %vm118_vm6, %v120_v61, %v116_v57  ;;  %vm130_vm11 = vmor %vm128_vm10, %vm129_vm8 }
  0xa8   :  { %v288_v56 = vpop.eup %287  ;;  %v125_v58 = vsub.f32 1.0, %v124_v51  ;;  %v151_v9 = vsel %vm148_vm9, %v150_v4, %v146_v1  ;;  %v192_v11 = vmul.f32 %v175_v48, %v121_v3 }
  0xa9   :  { %v154_v60 = vmul.f32 %v288_v56, %v107_v41  ;;  %vm159_vm12 = vweird.f32 %v288_v56  ;;  %v194_v19 = vmul.f32 %v185_v13, %v151_v9 }
  0xaa   :  { %v126_v63 = vmul.f32 %v286_v47, %v125_v58  ;;  %vm160_vm0 = vmor %vm158_vm14, %vm159_vm12  ;;  %v197_v22 = vsel %vm196_vm15, %v192_v11, 0.0 }
  0xab   :  { %v155_v2 = vsub.f32 1.0, %v154_v60  ;;  %v200_v27 = vsel %vm196_vm15, %v194_v19, 0.0 }
  0xac   :  { %v127_v6 = vadd.f32 %v286_v47, %v126_v63 }
  0xad   :  { %v156_v8 = vmul.f32 %v288_v56, %v155_v2 }
  0xae   :  { %v131_v12 = vsel %vm130_vm11, %v286_v47, %v127_v6 }
  0xaf   :  { %v136_v15 = vsel %vm133_vm13, %v135_v7, %v131_v12  ;;  %v157_v16 = vadd.f32 %v288_v56, %v156_v8 }
  0xb0   :  { %v193_v18 = vmul.f32 %v180_v14, %v136_v15 }
  0xb1   :  { %v161_v20 = vsel %vm160_vm0, %v288_v56, %v157_v16 }
  0xb2   :  { %v166_v23 = vsel %vm163_vm1, %v165_v17, %v161_v20  ;;  %v198_v24 = vsel %vm196_vm15, %v193_v18, 0.0 }
  0xb3   :  { %v195_v25 = vmul.f32 %v190_v21, %v166_v23  ;;  %v199_v26 = vadd.f32 %v198_v24, %v197_v22 }
  0xb5   :  { %v201_v28 = vadd.f32 %v200_v27, %v199_v26  ;;  %v202_v29 = vsel %vm196_vm15, %v195_v25, 0.0 }
  0xb7   :  { %v203_v30 = vadd.f32 %v202_v29, %v201_v28 }
  0xb9   :  { %v204_v31 = vrot.slane %v203_v30, 4 }
  0xbb   :  { %v205_v32 = vadd.f32 %v204_v31, %v203_v30 }
  0xbd   :  { %v206_v33 = vrot.slane %v205_v32, 2 }
  0xbf   :  { %v207_v34 = vadd.f32 %v206_v33, %v205_v32 }
  0xc1   :  { %v208_v35 = vrot.slane %v207_v34, 1 }
  0xc3   :  { %v209_v37 = vadd.f32 %v208_v35, %v207_v34 }
  0xc5   :  { %v212_v38 = vadd.f32 %v211_v36, %v209_v37 }
  0xc7   :  { %v264_v39 = vmul.f32 -1.442695, %v212_v38 }
  0xc9   :  { %289 = vpow2.f32 %v264_v39 }
  0xcf   :  { %v290_v40 = vpop.eup %289 }
  0xd0   :  { %v216_v41 = vadd.f32 1.0, %v290_v40 }
  0xd2   :  { %291 = vrcp.f32 %v216_v41  ;;  %v228_v45 = vand.u32 2147483648, %v216_v41  ;;  %v226_v47 = vand.u32 2147483647, %v216_v41  ;;  %vm222_vm3 = vweird.f32 %v216_v41 }
  0xd4   :  { %v229_v49 = vor.u32 1.1754944e-38, %v228_v45  ;;  %vm227_vm6 = vcmp.eq.f32.partialorder %v226_v47, 8.507059e+37 }
  0xd8   :  { %v292_v42 = vpop.eup %291 }
  0xd9   :  { %v218_v43 = vmul.f32 %v292_v42, %v216_v41  ;;  %vm223_vm2 = vweird.f32 %v292_v42 }
  0xda   :  { %vm224_vm4 = vmor %vm222_vm3, %vm223_vm2 }
  0xdb   :  { %v219_v44 = vsub.f32 1.0, %v218_v43 }
  0xdd   :  { %v220_v46 = vmul.f32 %v292_v42, %v219_v44 }
  0xdf   :  { %v221_v48 = vadd.f32 %v292_v42, %v220_v46 }
  0xe1   :  { %v225_v50 = vsel %vm224_vm4, %v292_v42, %v221_v48 }
  0xe2   :  { %v230_v51 = vsel %vm227_vm6, %v229_v49, %v225_v50 }
  0xe3   :  { %233 = vst.msk [vmem:[#allocation3] sm:$0x1] %vm232_vm5, %v230_v51 }
  0xe4   :  { %244 = dma.vmem_to_hbm [thread:$0]  %s240_s14, 16, %s242_s4, [#allocation4]  }
  0xe5   :  { %317 = dma.done.wait [#allocation4], 16  }
  0xe6   :  { %318 = vsyncadd [#allocation4], 4294967280 }
  0xe7   :  { %249 = vsyncpa [#allocation4], 1 }

</bundles_post_ra>
